<compile_context>
chip_gen: v7x
topology: tpu7x:2x2x1
jax: 0.10.0
libtpu: 0.0.40
codegen_flags: <defaults>
</compile_context>

<pallas_src>
import functools

import jax
import jax.numpy as jnp
from jax.experimental import pallas as pl
from jax.experimental.pallas import tpu as pltpu

_PAD_LANES = 128  # lane-dense classifier-head output width


def _lstm_fc_kernel(tok_ref, table_ref, whh_ref, wfc_ref, bfc_ref, out_ref):
    """tok_ref: SMEM (B, S) int32 token ids.
    table_ref: VMEM (V, 4H) folded  embedding @ W_ih^T + bias  (g lanes pre-scaled by 2).
    whh_ref:   VMEM (H, 4H) W_hh^T (g columns pre-scaled by 2).
    wfc_ref:   VMEM (H, 128) W_fc^T zero-padded to 128 lanes.
    bfc_ref:   VMEM (1, 128) b_fc zero-padded.
    out_ref:   VMEM (B, 128) padded logits.
    """
    B, S = tok_ref.shape
    H = whh_ref.shape[0]

    # Loop-invariant lane mask: lanes [2H, 3H) are the g-gate (tanh via sigmoid identity).
    lane = jax.lax.broadcasted_iota(jnp.int32, (B, 4 * H), 1)
    g_mask = (lane >= 2 * H) & (lane < 3 * H)

    def gather_gates(t):
        # In-kernel embedding gather: B scalar SMEM reads + B dynamic single-row VMEM
        # slices of the folded table.  Each row already equals W_ih x_t + bias.
        rows = [table_ref[pl.ds(tok_ref[b, t], 1), :] for b in range(B)]
        return jnp.concatenate(rows, axis=0)                       # (B, 4H)

    def step(t, carry):
        h, c = carry                                               # vreg-resident
        gates = gather_gates(t) + jnp.dot(h, whh_ref[...],
                                          preferred_element_type=jnp.float32)
        # Single full-width EUP pass: tanh(x) = 2*sigmoid(2x) - 1; the 2x scaling of the
        # g lanes is folded into the weights offline, the 2*s - 1 rides in the VALU slots.
        sig = jax.nn.sigmoid(gates)
        act = jnp.where(g_mask, sig + sig - 1.0, sig)
        i_g = act[:, 0:H]
        f_g = act[:, H:2 * H]
        g_g = act[:, 2 * H:3 * H]
        o_g = act[:, 3 * H:4 * H]
        c_new = f_g * c + i_g * g_g
        h_new = o_g * jnp.tanh(c_new)                              # 2nd (unavoidable) EUP pass
        return (h_new, c_new)

    h0 = jnp.zeros((B, H), jnp.float32)
    c0 = jnp.zeros((B, H), jnp.float32)
    # S is small and static -> fully unroll so adjacent steps interleave in the bundles
    # (the table gathers for step t+1 do not depend on h/c and can be hoisted off the
    # serial chain by the scheduler).
    h_last, _ = jax.lax.fori_loop(0, S, step, (h0, c0), unroll=True)

    # Classifier head, lane-dense: last_hidden @ W_fc^T(padded) + b_fc(padded).
    out_ref[...] = (jnp.dot(h_last, wfc_ref[...],
                            preferred_element_type=jnp.float32) + bfc_ref[...])


def prepare_params(params):
    """One-time weight prep (fold/transpose/pad) done OUTSIDE the per-call forward."""
    H = params["w_hh"].shape[1]
    C = params["w_fc"].shape[0]

    emb = params["embedding"].astype(jnp.float32)                       # (V, E)
    wih_t = jnp.transpose(params["w_ih"]).astype(jnp.float32)           # (E, 4H)
    whh_t = jnp.transpose(params["w_hh"]).astype(jnp.float32)           # (H, 4H)
    bias = (params["b_ih"] + params["b_hh"]).astype(jnp.float32)        # (4H,)

    # Fold W_ih^T and the fused bias into the embedding table: (V, 4H).
    table = emb @ wih_t + bias[None, :]

    # Pre-scale the g-gate columns by 2 so the kernel needs only one sigmoid per step
    # (tanh(x) = 2*sigmoid(2x) - 1).
    col = jnp.arange(4 * H)
    gscale = jnp.where((col >= 2 * H) & (col < 3 * H), 2.0, 1.0).astype(jnp.float32)
    table = table * gscale[None, :]
    whh_t = whh_t * gscale[None, :]

    # Lane-dense head: pad num_classes up to 128 with zero weight/bias columns.
    wfc_t = jnp.zeros((H, _PAD_LANES), jnp.float32)
    wfc_t = wfc_t.at[:, :C].set(jnp.transpose(params["w_fc"]).astype(jnp.float32))
    bfc = jnp.zeros((1, _PAD_LANES), jnp.float32)
    bfc = bfc.at[0, :C].set(params["b_fc"].astype(jnp.float32))

    return {"table": table, "whh_t": whh_t, "wfc_t": wfc_t, "bfc": bfc}


@functools.partial(jax.jit, static_argnames=("num_classes",))
def text_classifier_forward(x_tokens, prepped, *, num_classes):
    """x_tokens: (B, S) int32 token ids. Returns logits (B, num_classes) f32."""
    B, _ = x_tokens.shape

    smem_spec = pl.BlockSpec(memory_space=pltpu.MemorySpace.SMEM)
    vmem_spec = pl.BlockSpec(memory_space=pltpu.MemorySpace.VMEM)

    logits_padded = pl.pallas_call(
        _lstm_fc_kernel,
        out_shape=jax.ShapeDtypeStruct((B, _PAD_LANES), jnp.float32),
        in_specs=[smem_spec, vmem_spec, vmem_spec, vmem_spec, vmem_spec],
        out_specs=vmem_spec,
    )(x_tokens.astype(jnp.int32), prepped["table"], prepped["whh_t"],
      prepped["wfc_t"], prepped["bfc"])

    return logits_padded[:, :num_classes]


def _reference_forward(x_tokens, params):
    """Pure-JAX reference mirroring PyTorch semantics (for verification)."""
    emb = params["embedding"]
    H = params["w_hh"].shape[1]
    w_ih_t = params["w_ih"].T
    w_hh_t = params["w_hh"].T
    bias = params["b_ih"] + params["b_hh"]

    embedded = jnp.take(emb, x_tokens, axis=0).astype(jnp.float32)      # (B, S, E)
    B = embedded.shape[0]

    def step(carry, x_t):
        h, c = carry
        gates = x_t @ w_ih_t + h @ w_hh_t + bias
        i = jax.nn.sigmoid(gates[:, 0:H])
        f = jax.nn.sigmoid(gates[:, H:2 * H])
        g = jnp.tanh(gates[:, 2 * H:3 * H])
        o = jax.nn.sigmoid(gates[:, 3 * H:4 * H])
        c = f * c + i * g
        h = o * jnp.tanh(c)
        return (h, c), None

    h0 = jnp.zeros((B, H), jnp.float32)
    c0 = jnp.zeros((B, H), jnp.float32)
    (h_last, _), _ = jax.lax.scan(step, (h0, c0),
                                  jnp.transpose(embedded, (1, 0, 2)))
    return h_last @ params["w_fc"].T + params["b_fc"]


def init_params(key, vocab_size, embedding_dim, hidden_dim, num_classes):
    ks = jax.random.split(key, 7)
    bound = 1.0 / jnp.sqrt(hidden_dim)
    return {
        "embedding": jax.random.normal(ks[0], (vocab_size, embedding_dim),
                                       jnp.float32),
        "w_ih": jax.random.uniform(ks[1], (4 * hidden_dim, embedding_dim),
                                   jnp.float32, -bound, bound),
        "w_hh": jax.random.uniform(ks[2], (4 * hidden_dim, hidden_dim),
                                   jnp.float32, -bound, bound),
        "b_ih": jax.random.uniform(ks[3], (4 * hidden_dim,), jnp.float32,
                                   -bound, bound),
        "b_hh": jax.random.uniform(ks[4], (4 * hidden_dim,), jnp.float32,
                                   -bound, bound),
        "w_fc": jax.random.uniform(ks[5], (num_classes, hidden_dim),
                                   jnp.float32, -bound, bound),
        "b_fc": jax.random.uniform(ks[6], (num_classes,), jnp.float32,
                                   -bound, bound),
    }


if __name__ == "__main__":
    # HyperParameters: vocab_size=32, embedding_dim=16, hidden_dim=32, num_classes=4
    B, S = 2, 8
    VOCAB, EMB, HID, CLS = 32, 16, 32, 4

    key = jax.random.PRNGKey(0)
    k_tok, k_par = jax.random.split(key)
    params = init_params(k_par, VOCAB, EMB, HID, CLS)
    x = jax.random.randint(k_tok, (B, S), 0, VOCAB, dtype=jnp.int32)

    prepped = prepare_params(params)        # one-time weight fold/transpose/pad
    logits = text_classifier_forward(x, prepped, num_classes=CLS)
    jax.block_until_ready(logits)

    ref = _reference_forward(x, params)
    assert logits.shape == (B, CLS)
    assert jnp.allclose(logits, ref, atol=1e-4, rtol=1e-4), "mismatch vs reference"

    print("KERNEL_OK")
</pallas_src>

<mosaic_0001>
module attributes {stable_mosaic.version = 11 : i64} {
  func.func @_lstm_fc_kernel(%arg0: memref<2x8xi32, #tpu.memory_space<smem>>, %arg1: memref<32x128xf32, #tpu.memory_space<vmem>>, %arg2: memref<32x128xf32, #tpu.memory_space<vmem>>, %arg3: memref<32x128xf32, #tpu.memory_space<vmem>>, %arg4: memref<1x128xf32, #tpu.memory_space<vmem>>, %arg5: memref<2x128xf32, #tpu.memory_space<vmem>>) attributes {dimension_semantics = [], scalar_prefetch = 0 : i64, scratch_operands = 0 : i64, tpu.core_type = #tpu.core_type<tc>} {
    %0 = tpu.iota {dimensions = array<i32: 1>} : vector<2x128xi32>
    %c64_i32 = arith.constant 64 : i32
    %1 = vector.broadcast %c64_i32 : i32 to vector<2x128xi32>
    %2 = arith.cmpi sge, %0, %1 : vector<2x128xi32>
    %c96_i32 = arith.constant 96 : i32
    %3 = vector.broadcast %c96_i32 : i32 to vector<2x128xi32>
    %4 = arith.cmpi slt, %0, %3 : vector<2x128xi32>
    %5 = arith.andi %2, %4 : vector<2x128xi1>
    %cst = arith.constant 0.000000e+00 : f32
    %6 = vector.broadcast %cst : f32 to vector<2x32xf32>
    %cst_0 = arith.constant 0.000000e+00 : f32
    %7 = vector.broadcast %cst_0 : f32 to vector<2x32xf32>
    %c0_i32 = arith.constant 0 : i32
    %c0 = arith.constant 0 : index
    %8 = arith.index_cast %c0_i32 : i32 to index
    %9 = memref.load %arg0[%c0, %8] : memref<2x8xi32, #tpu.memory_space<smem>>
    %10 = arith.index_cast %9 : i32 to index
    %c0_1 = arith.constant 0 : index
    %11 = vector.load %arg1[%10, %c0_1] : memref<32x128xf32, #tpu.memory_space<vmem>>, vector<1x128xf32>
    %c1 = arith.constant 1 : index
    %12 = arith.index_cast %c0_i32 : i32 to index
    %13 = memref.load %arg0[%c1, %12] : memref<2x8xi32, #tpu.memory_space<smem>>
    %14 = arith.index_cast %13 : i32 to index
    %c0_2 = arith.constant 0 : index
    %15 = vector.load %arg1[%14, %c0_2] : memref<32x128xf32, #tpu.memory_space<vmem>>, vector<1x128xf32>
    %16 = tpu.concatenate %11, %15 in 0 : vector<1x128xf32>, vector<1x128xf32> -> vector<2x128xf32>
    %c0_3 = arith.constant 0 : index
    %c0_4 = arith.constant 0 : index
    %17 = vector.load %arg2[%c0_3, %c0_4] : memref<32x128xf32, #tpu.memory_space<vmem>>, vector<32x128xf32>
    %cst_5 = arith.constant dense<0.000000e+00> : vector<2x128xf32>
    %18 = tpu.matmul %6, %17, %cst_5 {dimension_numbers = #tpu.dot_dimension_numbers<[1], [0], [0], [1], [0, 0, 1, 1], [], []>} : vector<2x32xf32>, vector<32x128xf32>, vector<2x128xf32> -> vector<2x128xf32>
    %19 = arith.addf %16, %18 : vector<2x128xf32>
    %20 = arith.negf %19 : vector<2x128xf32>
    %21 = math.exp %20 : vector<2x128xf32>
    %cst_6 = arith.constant 1.000000e+00 : f32
    %22 = vector.broadcast %cst_6 : f32 to vector<2x128xf32>
    %23 = arith.addf %22, %21 : vector<2x128xf32>
    %24 = arith.divf %22, %23 : vector<2x128xf32>
    %25 = arith.addf %24, %24 : vector<2x128xf32>
    %cst_7 = arith.constant 1.000000e+00 : f32
    %26 = vector.broadcast %cst_7 : f32 to vector<2x128xf32>
    %27 = arith.subf %25, %26 : vector<2x128xf32>
    %28 = arith.select %5, %27, %24 : vector<2x128xi1>, vector<2x128xf32>
    %29 = vector.extract_strided_slice %28 {offsets = [0, 0], sizes = [2, 32], strides = [1, 1]} : vector<2x128xf32> to vector<2x32xf32>
    %30 = vector.extract_strided_slice %28 {offsets = [0, 32], sizes = [2, 32], strides = [1, 1]} : vector<2x128xf32> to vector<2x32xf32>
    %31 = vector.extract_strided_slice %28 {offsets = [0, 64], sizes = [2, 32], strides = [1, 1]} : vector<2x128xf32> to vector<2x32xf32>
    %32 = vector.extract_strided_slice %28 {offsets = [0, 96], sizes = [2, 32], strides = [1, 1]} : vector<2x128xf32> to vector<2x32xf32>
    %33 = arith.mulf %30, %7 : vector<2x32xf32>
    %34 = arith.mulf %29, %31 : vector<2x32xf32>
    %35 = arith.addf %33, %34 : vector<2x32xf32>
    %36 = math.tanh %35 : vector<2x32xf32>
    %37 = arith.mulf %32, %36 : vector<2x32xf32>
    %c1_i32 = arith.constant 1 : i32
    %c0_8 = arith.constant 0 : index
    %38 = arith.index_cast %c1_i32 : i32 to index
    %39 = memref.load %arg0[%c0_8, %38] : memref<2x8xi32, #tpu.memory_space<smem>>
    %40 = arith.index_cast %39 : i32 to index
    %c0_9 = arith.constant 0 : index
    %41 = vector.load %arg1[%40, %c0_9] : memref<32x128xf32, #tpu.memory_space<vmem>>, vector<1x128xf32>
    %c1_10 = arith.constant 1 : index
    %42 = arith.index_cast %c1_i32 : i32 to index
    %43 = memref.load %arg0[%c1_10, %42] : memref<2x8xi32, #tpu.memory_space<smem>>
    %44 = arith.index_cast %43 : i32 to index
    %c0_11 = arith.constant 0 : index
    %45 = vector.load %arg1[%44, %c0_11] : memref<32x128xf32, #tpu.memory_space<vmem>>, vector<1x128xf32>
    %46 = tpu.concatenate %41, %45 in 0 : vector<1x128xf32>, vector<1x128xf32> -> vector<2x128xf32>
    %c0_12 = arith.constant 0 : index
    %c0_13 = arith.constant 0 : index
    %47 = vector.load %arg2[%c0_12, %c0_13] : memref<32x128xf32, #tpu.memory_space<vmem>>, vector<32x128xf32>
    %cst_14 = arith.constant dense<0.000000e+00> : vector<2x128xf32>
    %48 = tpu.matmul %37, %47, %cst_14 {dimension_numbers = #tpu.dot_dimension_numbers<[1], [0], [0], [1], [0, 0, 1, 1], [], []>} : vector<2x32xf32>, vector<32x128xf32>, vector<2x128xf32> -> vector<2x128xf32>
    %49 = arith.addf %46, %48 : vector<2x128xf32>
    %50 = arith.negf %49 : vector<2x128xf32>
    %51 = math.exp %50 : vector<2x128xf32>
    %cst_15 = arith.constant 1.000000e+00 : f32
    %52 = vector.broadcast %cst_15 : f32 to vector<2x128xf32>
    %53 = arith.addf %52, %51 : vector<2x128xf32>
    %54 = arith.divf %52, %53 : vector<2x128xf32>
    %55 = arith.addf %54, %54 : vector<2x128xf32>
    %cst_16 = arith.constant 1.000000e+00 : f32
    %56 = vector.broadcast %cst_16 : f32 to vector<2x128xf32>
    %57 = arith.subf %55, %56 : vector<2x128xf32>
    %58 = arith.select %5, %57, %54 : vector<2x128xi1>, vector<2x128xf32>
    %59 = vector.extract_strided_slice %58 {offsets = [0, 0], sizes = [2, 32], strides = [1, 1]} : vector<2x128xf32> to vector<2x32xf32>
    %60 = vector.extract_strided_slice %58 {offsets = [0, 32], sizes = [2, 32], strides = [1, 1]} : vector<2x128xf32> to vector<2x32xf32>
    %61 = vector.extract_strided_slice %58 {offsets = [0, 64], sizes = [2, 32], strides = [1, 1]} : vector<2x128xf32> to vector<2x32xf32>
    %62 = vector.extract_strided_slice %58 {offsets = [0, 96], sizes = [2, 32], strides = [1, 1]} : vector<2x128xf32> to vector<2x32xf32>
    %63 = arith.mulf %60, %35 : vector<2x32xf32>
    %64 = arith.mulf %59, %61 : vector<2x32xf32>
    %65 = arith.addf %63, %64 : vector<2x32xf32>
    %66 = math.tanh %65 : vector<2x32xf32>
    %67 = arith.mulf %62, %66 : vector<2x32xf32>
    %c2_i32 = arith.constant 2 : i32
    %c0_17 = arith.constant 0 : index
    %68 = arith.index_cast %c2_i32 : i32 to index
    %69 = memref.load %arg0[%c0_17, %68] : memref<2x8xi32, #tpu.memory_space<smem>>
    %70 = arith.index_cast %69 : i32 to index
    %c0_18 = arith.constant 0 : index
    %71 = vector.load %arg1[%70, %c0_18] : memref<32x128xf32, #tpu.memory_space<vmem>>, vector<1x128xf32>
    %c1_19 = arith.constant 1 : index
    %72 = arith.index_cast %c2_i32 : i32 to index
    %73 = memref.load %arg0[%c1_19, %72] : memref<2x8xi32, #tpu.memory_space<smem>>
    %74 = arith.index_cast %73 : i32 to index
    %c0_20 = arith.constant 0 : index
    %75 = vector.load %arg1[%74, %c0_20] : memref<32x128xf32, #tpu.memory_space<vmem>>, vector<1x128xf32>
    %76 = tpu.concatenate %71, %75 in 0 : vector<1x128xf32>, vector<1x128xf32> -> vector<2x128xf32>
    %c0_21 = arith.constant 0 : index
    %c0_22 = arith.constant 0 : index
    %77 = vector.load %arg2[%c0_21, %c0_22] : memref<32x128xf32, #tpu.memory_space<vmem>>, vector<32x128xf32>
    %cst_23 = arith.constant dense<0.000000e+00> : vector<2x128xf32>
    %78 = tpu.matmul %67, %77, %cst_23 {dimension_numbers = #tpu.dot_dimension_numbers<[1], [0], [0], [1], [0, 0, 1, 1], [], []>} : vector<2x32xf32>, vector<32x128xf32>, vector<2x128xf32> -> vector<2x128xf32>
    %79 = arith.addf %76, %78 : vector<2x128xf32>
    %80 = arith.negf %79 : vector<2x128xf32>
    %81 = math.exp %80 : vector<2x128xf32>
    %cst_24 = arith.constant 1.000000e+00 : f32
    %82 = vector.broadcast %cst_24 : f32 to vector<2x128xf32>
    %83 = arith.addf %82, %81 : vector<2x128xf32>
    %84 = arith.divf %82, %83 : vector<2x128xf32>
    %85 = arith.addf %84, %84 : vector<2x128xf32>
    %cst_25 = arith.constant 1.000000e+00 : f32
    %86 = vector.broadcast %cst_25 : f32 to vector<2x128xf32>
    %87 = arith.subf %85, %86 : vector<2x128xf32>
    %88 = arith.select %5, %87, %84 : vector<2x128xi1>, vector<2x128xf32>
    %89 = vector.extract_strided_slice %88 {offsets = [0, 0], sizes = [2, 32], strides = [1, 1]} : vector<2x128xf32> to vector<2x32xf32>
    %90 = vector.extract_strided_slice %88 {offsets = [0, 32], sizes = [2, 32], strides = [1, 1]} : vector<2x128xf32> to vector<2x32xf32>
    %91 = vector.extract_strided_slice %88 {offsets = [0, 64], sizes = [2, 32], strides = [1, 1]} : vector<2x128xf32> to vector<2x32xf32>
    %92 = vector.extract_strided_slice %88 {offsets = [0, 96], sizes = [2, 32], strides = [1, 1]} : vector<2x128xf32> to vector<2x32xf32>
    %93 = arith.mulf %90, %65 : vector<2x32xf32>
    %94 = arith.mulf %89, %91 : vector<2x32xf32>
    %95 = arith.addf %93, %94 : vector<2x32xf32>
    %96 = math.tanh %95 : vector<2x32xf32>
    %97 = arith.mulf %92, %96 : vector<2x32xf32>
    %c3_i32 = arith.constant 3 : i32
    %c0_26 = arith.constant 0 : index
    %98 = arith.index_cast %c3_i32 : i32 to index
    %99 = memref.load %arg0[%c0_26, %98] : memref<2x8xi32, #tpu.memory_space<smem>>
    %100 = arith.index_cast %99 : i32 to index
    %c0_27 = arith.constant 0 : index
    %101 = vector.load %arg1[%100, %c0_27] : memref<32x128xf32, #tpu.memory_space<vmem>>, vector<1x128xf32>
    %c1_28 = arith.constant 1 : index
    %102 = arith.index_cast %c3_i32 : i32 to index
    %103 = memref.load %arg0[%c1_28, %102] : memref<2x8xi32, #tpu.memory_space<smem>>
    %104 = arith.index_cast %103 : i32 to index
    %c0_29 = arith.constant 0 : index
    %105 = vector.load %arg1[%104, %c0_29] : memref<32x128xf32, #tpu.memory_space<vmem>>, vector<1x128xf32>
    %106 = tpu.concatenate %101, %105 in 0 : vector<1x128xf32>, vector<1x128xf32> -> vector<2x128xf32>
    %c0_30 = arith.constant 0 : index
    %c0_31 = arith.constant 0 : index
    %107 = vector.load %arg2[%c0_30, %c0_31] : memref<32x128xf32, #tpu.memory_space<vmem>>, vector<32x128xf32>
    %cst_32 = arith.constant dense<0.000000e+00> : vector<2x128xf32>
    %108 = tpu.matmul %97, %107, %cst_32 {dimension_numbers = #tpu.dot_dimension_numbers<[1], [0], [0], [1], [0, 0, 1, 1], [], []>} : vector<2x32xf32>, vector<32x128xf32>, vector<2x128xf32> -> vector<2x128xf32>
    %109 = arith.addf %106, %108 : vector<2x128xf32>
    %110 = arith.negf %109 : vector<2x128xf32>
    %111 = math.exp %110 : vector<2x128xf32>
    %cst_33 = arith.constant 1.000000e+00 : f32
    %112 = vector.broadcast %cst_33 : f32 to vector<2x128xf32>
    %113 = arith.addf %112, %111 : vector<2x128xf32>
    %114 = arith.divf %112, %113 : vector<2x128xf32>
    %115 = arith.addf %114, %114 : vector<2x128xf32>
    %cst_34 = arith.constant 1.000000e+00 : f32
    %116 = vector.broadcast %cst_34 : f32 to vector<2x128xf32>
    %117 = arith.subf %115, %116 : vector<2x128xf32>
    %118 = arith.select %5, %117, %114 : vector<2x128xi1>, vector<2x128xf32>
    %119 = vector.extract_strided_slice %118 {offsets = [0, 0], sizes = [2, 32], strides = [1, 1]} : vector<2x128xf32> to vector<2x32xf32>
    %120 = vector.extract_strided_slice %118 {offsets = [0, 32], sizes = [2, 32], strides = [1, 1]} : vector<2x128xf32> to vector<2x32xf32>
    %121 = vector.extract_strided_slice %118 {offsets = [0, 64], sizes = [2, 32], strides = [1, 1]} : vector<2x128xf32> to vector<2x32xf32>
    %122 = vector.extract_strided_slice %118 {offsets = [0, 96], sizes = [2, 32], strides = [1, 1]} : vector<2x128xf32> to vector<2x32xf32>
    %123 = arith.mulf %120, %95 : vector<2x32xf32>
    %124 = arith.mulf %119, %121 : vector<2x32xf32>
    %125 = arith.addf %123, %124 : vector<2x32xf32>
    %126 = math.tanh %125 : vector<2x32xf32>
    %127 = arith.mulf %122, %126 : vector<2x32xf32>
    %c4_i32 = arith.constant 4 : i32
    %c0_35 = arith.constant 0 : index
    %128 = arith.index_cast %c4_i32 : i32 to index
    %129 = memref.load %arg0[%c0_35, %128] : memref<2x8xi32, #tpu.memory_space<smem>>
    %130 = arith.index_cast %129 : i32 to index
    %c0_36 = arith.constant 0 : index
    %131 = vector.load %arg1[%130, %c0_36] : memref<32x128xf32, #tpu.memory_space<vmem>>, vector<1x128xf32>
    %c1_37 = arith.constant 1 : index
    %132 = arith.index_cast %c4_i32 : i32 to index
    %133 = memref.load %arg0[%c1_37, %132] : memref<2x8xi32, #tpu.memory_space<smem>>
    %134 = arith.index_cast %133 : i32 to index
    %c0_38 = arith.constant 0 : index
    %135 = vector.load %arg1[%134, %c0_38] : memref<32x128xf32, #tpu.memory_space<vmem>>, vector<1x128xf32>
    %136 = tpu.concatenate %131, %135 in 0 : vector<1x128xf32>, vector<1x128xf32> -> vector<2x128xf32>
    %c0_39 = arith.constant 0 : index
    %c0_40 = arith.constant 0 : index
    %137 = vector.load %arg2[%c0_39, %c0_40] : memref<32x128xf32, #tpu.memory_space<vmem>>, vector<32x128xf32>
    %cst_41 = arith.constant dense<0.000000e+00> : vector<2x128xf32>
    %138 = tpu.matmul %127, %137, %cst_41 {dimension_numbers = #tpu.dot_dimension_numbers<[1], [0], [0], [1], [0, 0, 1, 1], [], []>} : vector<2x32xf32>, vector<32x128xf32>, vector<2x128xf32> -> vector<2x128xf32>
    %139 = arith.addf %136, %138 : vector<2x128xf32>
    %140 = arith.negf %139 : vector<2x128xf32>
    %141 = math.exp %140 : vector<2x128xf32>
    %cst_42 = arith.constant 1.000000e+00 : f32
    %142 = vector.broadcast %cst_42 : f32 to vector<2x128xf32>
    %143 = arith.addf %142, %141 : vector<2x128xf32>
    %144 = arith.divf %142, %143 : vector<2x128xf32>
    %145 = arith.addf %144, %144 : vector<2x128xf32>
    %cst_43 = arith.constant 1.000000e+00 : f32
    %146 = vector.broadcast %cst_43 : f32 to vector<2x128xf32>
    %147 = arith.subf %145, %146 : vector<2x128xf32>
    %148 = arith.select %5, %147, %144 : vector<2x128xi1>, vector<2x128xf32>
    %149 = vector.extract_strided_slice %148 {offsets = [0, 0], sizes = [2, 32], strides = [1, 1]} : vector<2x128xf32> to vector<2x32xf32>
    %150 = vector.extract_strided_slice %148 {offsets = [0, 32], sizes = [2, 32], strides = [1, 1]} : vector<2x128xf32> to vector<2x32xf32>
    %151 = vector.extract_strided_slice %148 {offsets = [0, 64], sizes = [2, 32], strides = [1, 1]} : vector<2x128xf32> to vector<2x32xf32>
    %152 = vector.extract_strided_slice %148 {offsets = [0, 96], sizes = [2, 32], strides = [1, 1]} : vector<2x128xf32> to vector<2x32xf32>
    %153 = arith.mulf %150, %125 : vector<2x32xf32>
    %154 = arith.mulf %149, %151 : vector<2x32xf32>
    %155 = arith.addf %153, %154 : vector<2x32xf32>
    %156 = math.tanh %155 : vector<2x32xf32>
    %157 = arith.mulf %152, %156 : vector<2x32xf32>
    %c5_i32 = arith.constant 5 : i32
    %c0_44 = arith.constant 0 : index
    %158 = arith.index_cast %c5_i32 : i32 to index
    %159 = memref.load %arg0[%c0_44, %158] : memref<2x8xi32, #tpu.memory_space<smem>>
    %160 = arith.index_cast %159 : i32 to index
    %c0_45 = arith.constant 0 : index
    %161 = vector.load %arg1[%160, %c0_45] : memref<32x128xf32, #tpu.memory_space<vmem>>, vector<1x128xf32>
    %c1_46 = arith.constant 1 : index
    %162 = arith.index_cast %c5_i32 : i32 to index
    %163 = memref.load %arg0[%c1_46, %162] : memref<2x8xi32, #tpu.memory_space<smem>>
    %164 = arith.index_cast %163 : i32 to index
    %c0_47 = arith.constant 0 : index
    %165 = vector.load %arg1[%164, %c0_47] : memref<32x128xf32, #tpu.memory_space<vmem>>, vector<1x128xf32>
    %166 = tpu.concatenate %161, %165 in 0 : vector<1x128xf32>, vector<1x128xf32> -> vector<2x128xf32>
    %c0_48 = arith.constant 0 : index
    %c0_49 = arith.constant 0 : index
    %167 = vector.load %arg2[%c0_48, %c0_49] : memref<32x128xf32, #tpu.memory_space<vmem>>, vector<32x128xf32>
    %cst_50 = arith.constant dense<0.000000e+00> : vector<2x128xf32>
    %168 = tpu.matmul %157, %167, %cst_50 {dimension_numbers = #tpu.dot_dimension_numbers<[1], [0], [0], [1], [0, 0, 1, 1], [], []>} : vector<2x32xf32>, vector<32x128xf32>, vector<2x128xf32> -> vector<2x128xf32>
    %169 = arith.addf %166, %168 : vector<2x128xf32>
    %170 = arith.negf %169 : vector<2x128xf32>
    %171 = math.exp %170 : vector<2x128xf32>
    %cst_51 = arith.constant 1.000000e+00 : f32
    %172 = vector.broadcast %cst_51 : f32 to vector<2x128xf32>
    %173 = arith.addf %172, %171 : vector<2x128xf32>
    %174 = arith.divf %172, %173 : vector<2x128xf32>
    %175 = arith.addf %174, %174 : vector<2x128xf32>
    %cst_52 = arith.constant 1.000000e+00 : f32
    %176 = vector.broadcast %cst_52 : f32 to vector<2x128xf32>
    %177 = arith.subf %175, %176 : vector<2x128xf32>
    %178 = arith.select %5, %177, %174 : vector<2x128xi1>, vector<2x128xf32>
    %179 = vector.extract_strided_slice %178 {offsets = [0, 0], sizes = [2, 32], strides = [1, 1]} : vector<2x128xf32> to vector<2x32xf32>
    %180 = vector.extract_strided_slice %178 {offsets = [0, 32], sizes = [2, 32], strides = [1, 1]} : vector<2x128xf32> to vector<2x32xf32>
    %181 = vector.extract_strided_slice %178 {offsets = [0, 64], sizes = [2, 32], strides = [1, 1]} : vector<2x128xf32> to vector<2x32xf32>
    %182 = vector.extract_strided_slice %178 {offsets = [0, 96], sizes = [2, 32], strides = [1, 1]} : vector<2x128xf32> to vector<2x32xf32>
    %183 = arith.mulf %180, %155 : vector<2x32xf32>
    %184 = arith.mulf %179, %181 : vector<2x32xf32>
    %185 = arith.addf %183, %184 : vector<2x32xf32>
    %186 = math.tanh %185 : vector<2x32xf32>
    %187 = arith.mulf %182, %186 : vector<2x32xf32>
    %c6_i32 = arith.constant 6 : i32
    %c0_53 = arith.constant 0 : index
    %188 = arith.index_cast %c6_i32 : i32 to index
    %189 = memref.load %arg0[%c0_53, %188] : memref<2x8xi32, #tpu.memory_space<smem>>
    %190 = arith.index_cast %189 : i32 to index
    %c0_54 = arith.constant 0 : index
    %191 = vector.load %arg1[%190, %c0_54] : memref<32x128xf32, #tpu.memory_space<vmem>>, vector<1x128xf32>
    %c1_55 = arith.constant 1 : index
    %192 = arith.index_cast %c6_i32 : i32 to index
    %193 = memref.load %arg0[%c1_55, %192] : memref<2x8xi32, #tpu.memory_space<smem>>
    %194 = arith.index_cast %193 : i32 to index
    %c0_56 = arith.constant 0 : index
    %195 = vector.load %arg1[%194, %c0_56] : memref<32x128xf32, #tpu.memory_space<vmem>>, vector<1x128xf32>
    %196 = tpu.concatenate %191, %195 in 0 : vector<1x128xf32>, vector<1x128xf32> -> vector<2x128xf32>
    %c0_57 = arith.constant 0 : index
    %c0_58 = arith.constant 0 : index
    %197 = vector.load %arg2[%c0_57, %c0_58] : memref<32x128xf32, #tpu.memory_space<vmem>>, vector<32x128xf32>
    %cst_59 = arith.constant dense<0.000000e+00> : vector<2x128xf32>
    %198 = tpu.matmul %187, %197, %cst_59 {dimension_numbers = #tpu.dot_dimension_numbers<[1], [0], [0], [1], [0, 0, 1, 1], [], []>} : vector<2x32xf32>, vector<32x128xf32>, vector<2x128xf32> -> vector<2x128xf32>
    %199 = arith.addf %196, %198 : vector<2x128xf32>
    %200 = arith.negf %199 : vector<2x128xf32>
    %201 = math.exp %200 : vector<2x128xf32>
    %cst_60 = arith.constant 1.000000e+00 : f32
    %202 = vector.broadcast %cst_60 : f32 to vector<2x128xf32>
    %203 = arith.addf %202, %201 : vector<2x128xf32>
    %204 = arith.divf %202, %203 : vector<2x128xf32>
    %205 = arith.addf %204, %204 : vector<2x128xf32>
    %cst_61 = arith.constant 1.000000e+00 : f32
    %206 = vector.broadcast %cst_61 : f32 to vector<2x128xf32>
    %207 = arith.subf %205, %206 : vector<2x128xf32>
    %208 = arith.select %5, %207, %204 : vector<2x128xi1>, vector<2x128xf32>
    %209 = vector.extract_strided_slice %208 {offsets = [0, 0], sizes = [2, 32], strides = [1, 1]} : vector<2x128xf32> to vector<2x32xf32>
    %210 = vector.extract_strided_slice %208 {offsets = [0, 32], sizes = [2, 32], strides = [1, 1]} : vector<2x128xf32> to vector<2x32xf32>
    %211 = vector.extract_strided_slice %208 {offsets = [0, 64], sizes = [2, 32], strides = [1, 1]} : vector<2x128xf32> to vector<2x32xf32>
    %212 = vector.extract_strided_slice %208 {offsets = [0, 96], sizes = [2, 32], strides = [1, 1]} : vector<2x128xf32> to vector<2x32xf32>
    %213 = arith.mulf %210, %185 : vector<2x32xf32>
    %214 = arith.mulf %209, %211 : vector<2x32xf32>
    %215 = arith.addf %213, %214 : vector<2x32xf32>
    %216 = math.tanh %215 : vector<2x32xf32>
    %217 = arith.mulf %212, %216 : vector<2x32xf32>
    %c7_i32 = arith.constant 7 : i32
    %c0_62 = arith.constant 0 : index
    %218 = arith.index_cast %c7_i32 : i32 to index
    %219 = memref.load %arg0[%c0_62, %218] : memref<2x8xi32, #tpu.memory_space<smem>>
    %220 = arith.index_cast %219 : i32 to index
    %c0_63 = arith.constant 0 : index
    %221 = vector.load %arg1[%220, %c0_63] : memref<32x128xf32, #tpu.memory_space<vmem>>, vector<1x128xf32>
    %c1_64 = arith.constant 1 : index
    %222 = arith.index_cast %c7_i32 : i32 to index
    %223 = memref.load %arg0[%c1_64, %222] : memref<2x8xi32, #tpu.memory_space<smem>>
    %224 = arith.index_cast %223 : i32 to index
    %c0_65 = arith.constant 0 : index
    %225 = vector.load %arg1[%224, %c0_65] : memref<32x128xf32, #tpu.memory_space<vmem>>, vector<1x128xf32>
    %226 = tpu.concatenate %221, %225 in 0 : vector<1x128xf32>, vector<1x128xf32> -> vector<2x128xf32>
    %c0_66 = arith.constant 0 : index
    %c0_67 = arith.constant 0 : index
    %227 = vector.load %arg2[%c0_66, %c0_67] : memref<32x128xf32, #tpu.memory_space<vmem>>, vector<32x128xf32>
    %cst_68 = arith.constant dense<0.000000e+00> : vector<2x128xf32>
    %228 = tpu.matmul %217, %227, %cst_68 {dimension_numbers = #tpu.dot_dimension_numbers<[1], [0], [0], [1], [0, 0, 1, 1], [], []>} : vector<2x32xf32>, vector<32x128xf32>, vector<2x128xf32> -> vector<2x128xf32>
    %229 = arith.addf %226, %228 : vector<2x128xf32>
    %230 = arith.negf %229 : vector<2x128xf32>
    %231 = math.exp %230 : vector<2x128xf32>
    %cst_69 = arith.constant 1.000000e+00 : f32
    %232 = vector.broadcast %cst_69 : f32 to vector<2x128xf32>
    %233 = arith.addf %232, %231 : vector<2x128xf32>
    %234 = arith.divf %232, %233 : vector<2x128xf32>
    %235 = arith.addf %234, %234 : vector<2x128xf32>
    %cst_70 = arith.constant 1.000000e+00 : f32
    %236 = vector.broadcast %cst_70 : f32 to vector<2x128xf32>
    %237 = arith.subf %235, %236 : vector<2x128xf32>
    %238 = arith.select %5, %237, %234 : vector<2x128xi1>, vector<2x128xf32>
    %239 = vector.extract_strided_slice %238 {offsets = [0, 0], sizes = [2, 32], strides = [1, 1]} : vector<2x128xf32> to vector<2x32xf32>
    %240 = vector.extract_strided_slice %238 {offsets = [0, 32], sizes = [2, 32], strides = [1, 1]} : vector<2x128xf32> to vector<2x32xf32>
    %241 = vector.extract_strided_slice %238 {offsets = [0, 64], sizes = [2, 32], strides = [1, 1]} : vector<2x128xf32> to vector<2x32xf32>
    %242 = vector.extract_strided_slice %238 {offsets = [0, 96], sizes = [2, 32], strides = [1, 1]} : vector<2x128xf32> to vector<2x32xf32>
    %243 = arith.mulf %240, %215 : vector<2x32xf32>
    %244 = arith.mulf %239, %241 : vector<2x32xf32>
    %245 = arith.addf %243, %244 : vector<2x32xf32>
    %246 = math.tanh %245 : vector<2x32xf32>
    %247 = arith.mulf %242, %246 : vector<2x32xf32>
    %c8_i32 = arith.constant 8 : i32
    %c0_71 = arith.constant 0 : index
    %c0_72 = arith.constant 0 : index
    %248 = vector.load %arg3[%c0_71, %c0_72] : memref<32x128xf32, #tpu.memory_space<vmem>>, vector<32x128xf32>
    %cst_73 = arith.constant dense<0.000000e+00> : vector<2x128xf32>
    %249 = tpu.matmul %247, %248, %cst_73 {dimension_numbers = #tpu.dot_dimension_numbers<[1], [0], [0], [1], [0, 0, 1, 1], [], []>} : vector<2x32xf32>, vector<32x128xf32>, vector<2x128xf32> -> vector<2x128xf32>
    %c0_74 = arith.constant 0 : index
    %c0_75 = arith.constant 0 : index
    %250 = vector.load %arg4[%c0_74, %c0_75] : memref<1x128xf32, #tpu.memory_space<vmem>>, vector<1x128xf32>
    %251 = vector.broadcast %250 : vector<1x128xf32> to vector<2x128xf32>
    %252 = arith.addf %249, %251 : vector<2x128xf32>
    %c0_76 = arith.constant 0 : index
    %c0_77 = arith.constant 0 : index
    %253 = vector.load %arg5[%c0_76, %c0_77] : memref<2x128xf32, #tpu.memory_space<vmem>>, vector<2x128xf32>
    tpu.vector_store %arg5[%c0_76, %c0_77], %252 {strides = array<i32>} : memref<2x128xf32, #tpu.memory_space<vmem>>, vector<2x128xf32>,
    return
  }
}

</mosaic_0001>

<bundles_post_ra>
// kernel: text_classifier_forward.1
= control target key start
LH: loop header
LB: loop body
LE: loop exit
PB: predicated region body
PF: predicated region fallthrough
CT: control target
= control target key end

     0   :  { %10 = vsyncpa [#allocation5], 0  ;;  %s1741_s0 = inlined_call_operand.hbm [shape: s32[2,8], index: 0, kind: input, shape index: {}]   ;;  %s1742_s1 = inlined_call_operand.hbm [shape: f32[32,128], index: 1, kind: input, shape index: {}]   ;;  %s1743_s2 = inlined_call_operand.hbm [shape: f32[32,128], index: 2, kind: input, shape index: {}]   ;;  %s1744_s3 = inlined_call_operand.hbm [shape: f32[32,128], index: 3, kind: input, shape index: {}]   ;;  %s1745_s4 = inlined_call_operand.vmem [shape: f32[1,128], index: 4, kind: input, shape index: {}]   ;;  %s1746_s5 = inlined_call_operand.hbm [shape: f32[2,128], index: 5, kind: output, shape index: {}]  }
   0x1   :  { %11 = vsyncpa [#allocation3], 0 }
   0x2   :  { %12 = vsyncpa [#allocation8], 0 }
   0x3   :  { %13 = vsyncpa [#allocation4], 0  ;;  %s1502_s18 = smov [#allocation7]   ;;  %s1503_s20 = smov [#allocation6]  }
   0x4   :  { %s39_s19 = sshll.u32 %s1502_s18, 4  ;;  %s27_s21 = sshll.u32 %s1503_s20, 4  ;;  %s40_s19 = int_to_ptr.vmem [resolvable:$true] %s39_s19  ;;  %s28_s21 = int_to_ptr.vmem [resolvable:$true] %s27_s21 }
   0x5   :  { %s1396_s24 = scalar_lea.hbm %s1743_s2, 512 }
   0x6   :  { %p1397_p0 = scmp.ne.s32.totalorder %s1743_s2, %s1396_s24  ;;  %p1400_p1 = scmp.lt.u32.totalorder %s1396_s24, %s1743_s2 }
   0x8   :  { %p1402_p2 = pnand %p1400_p1, %p1397_p0 }
   0xa   :  { %1405 = shalt.err (!%p1402_p2)
}
   0xb   :  { %s1406_s29 = scalar_lea.vmem %s40_s19, 512  ;;  %p1411_p4 = scmp.lt.s32.totalorder %s40_s19, %s40_s19 }
   0xc   :  { %p1407_p3 = scmp.ne.s32.totalorder %s40_s19, %s1406_s29  ;;  %p1412_p5 = scmp.lt.s32.totalorder %s1406_s29, %s1406_s29 }
   0xe   :  { %p1413_p6 = por %p1412_p5, %p1411_p4 }
  0x10   :  { %p1414_p7 = pnand %p1413_p6, %p1407_p3 }
  0x12   :  { %1417 = shalt.err (!%p1414_p7)
}
  0x13   :  { %s1504_s30 = smov 128   ;;  %s1505_s6 = smov 8  }
  0x14   :  { %45 = dma.hbm_to_vmem [thread:$0]  %s1743_s2, 512, %s40_s19, [#allocation8], %s1504_s30, %s1504_s30, %s1505_s6  }
  0x15   :  { %s1418_s11 = scalar_lea.hbm %s1741_s0, 32 }
  0x16   :  { %p1419_p8 = scmp.ne.s32.totalorder %s1741_s0, %s1418_s11  ;;  %p1422_p9 = scmp.lt.u32.totalorder %s1418_s11, %s1741_s0 }
  0x18   :  { %p1424_p10 = pnand %p1422_p9, %p1419_p8 }
  0x1a   :  { %1427 = shalt.err (!%p1424_p10)
}
  0x1b   :  { %s1506_s16 = smov [#allocation2]   ;;  %s1428_s20 = scalar_lea.hbm %s1742_s1, 512 }
  0x1c   :  { %21 = dma.hbm_to_smem %s1741_s0, 32, %s1506_s16, [#allocation5]  }
  0x1d   :  { %p1429_p11 = scmp.ne.s32.totalorder %s1742_s1, %s1428_s20  ;;  %p1432_p12 = scmp.lt.u32.totalorder %s1428_s20, %s1742_s1 }
  0x1f   :  { %p1434_p13 = pnand %p1432_p12, %p1429_p11 }
  0x21   :  { %1437 = shalt.err (!%p1434_p13)
}
  0x22   :  { %s1438_s26 = scalar_lea.vmem %s28_s21, 512  ;;  %p1443_p1 = scmp.lt.s32.totalorder %s28_s21, %s28_s21 }
  0x23   :  { %p1439_p0 = scmp.ne.s32.totalorder %s28_s21, %s1438_s26  ;;  %p1444_p2 = scmp.lt.s32.totalorder %s1438_s26, %s1438_s26 }
  0x25   :  { %p1445_p3 = por %p1444_p2, %p1443_p1 }
  0x27   :  { %p1446_p4 = pnand %p1445_p3, %p1439_p0 }
  0x29   :  { %1449 = shalt.err (!%p1446_p4)
}
  0x2a   :  { %33 = dma.hbm_to_vmem [thread:$0]  %s1742_s1, 512, %s28_s21, [#allocation3], %s1504_s30, %s1504_s30, %s1505_s6  }
  0x2b   :  { %s1507_s28 = smov [#allocation9]   ;;  %s1450_s9 = scalar_lea.hbm %s1744_s3, 512 }
  0x2c   :  { %s51_s29 = sshll.u32 %s1507_s28, 4  ;;  %p1451_p5 = scmp.ne.s32.totalorder %s1744_s3, %s1450_s9  ;;  %s52_s29 = int_to_ptr.vmem [resolvable:$true] %s51_s29 }
  0x2d   :  { %p1454_p6 = scmp.lt.u32.totalorder %s1450_s9, %s1744_s3 }
  0x2f   :  { %p1456_p7 = pnand %p1454_p6, %p1451_p5 }
  0x31   :  { %1459 = shalt.err (!%p1456_p7)
}
  0x32   :  { %s1460_s14 = scalar_lea.vmem %s52_s29, 512  ;;  %p1465_p9 = scmp.lt.s32.totalorder %s52_s29, %s52_s29 }
  0x33   :  { %p1461_p8 = scmp.ne.s32.totalorder %s52_s29, %s1460_s14  ;;  %p1466_p10 = scmp.lt.s32.totalorder %s1460_s14, %s1460_s14 }
  0x35   :  { %p1467_p11 = por %p1466_p10, %p1465_p9 }
  0x37   :  { %p1468_p12 = pnand %p1467_p11, %p1461_p8 }
  0x39   :  { %1471 = shalt.err (!%p1468_p12)
}
  0x3a   :  { %57 = dma.hbm_to_vmem [thread:$0]  %s1744_s3, 512, %s52_s29, [#allocation8], %s1504_s30, %s1504_s30, %s1505_s6  }
  0x3b   :  { %1494 = dma.done.wait [#allocation5], 32  }
  0x3c   :  { %1495 = vsyncadd [#allocation5], 4294967264 }
  0x3d   :  { %1496 = dma.done.wait [#allocation3], 512  }
  0x3e   :  { %1497 = vsyncadd [#allocation3], 4294966784 }
  0x3f   :  { %1498 = dma.done.wait [#allocation8], 1024  }
  0x40   :  { %1499 = vsyncadd [#allocation8], 4294966272 }
  0x41   :  { %72 = sfence }
  0x42   :  { %v89_v0 = vld [vmem:[#allocation7] sm:$0xff]  ;;  %v90_v1 = vld [vmem:[#allocation7 + $0x8] sm:$0xff]  ;;  %v91_v2 = vld [vmem:[#allocation7 + $0x10] sm:$0xff]  ;;  %v1508_v3 = vmov 0.0|0.0   ;;  %vm1509_vm0 = vmmov 0   ;;  %v1510_v6 = vmov 0.0   ;;  %v73_v18 = vlaneseq }
  0x43   :  { %1282 = vmatprep.subr.bf16.mxu0 %v1508_v3  ;;  %v1602_v4 = vpack.c.bf16 %v90_v1, %v89_v0  ;;  %v92_v5 = vld [vmem:[#allocation7 + $0x18] sm:$0xff]  ;;  %1191 = vmatprep.mubr.msk.f32.mxu0 %vm1509_vm0, %v1510_v6  ;;  %s1098_s3 = sld [smem:[#allocation2 + $0x80]]  ;;  %vm87_vm1 = vcmask 1040384   ;;  %s1511_s16 = smov 64   ;;  %vm93_vm5 = vcmask 261120  }
  0x44   :  { %1288 = vmatprep.subr.bf16.mxu1 %v1508_v3  ;;  %1202 = vmatprep.mubr.msk.f32.mxu1 %vm1509_vm0, %v1510_v6  ;;  %v1610_v7 = vpack.c.bf16 %v92_v5, %v91_v2  ;;  %s78_s30 = sld [smem:[#allocation2]]  ;;  %v74_v19 = vand.u32 127, %v73_v18  ;;  %s1512_s17 = smov 32  }
  0x45   :  { %1284 = vmatpush3.bf16.msra.mxu0 %v1602_v4  ;;  %1290 = vmatpush3.bf16.msra.mxu1 %v1602_v4  ;;  %s1102_s18 = sld [smem:[#allocation2 + $0x81]]  ;;  %s1107_s22 = sld [smem:[#allocation2 + $0x82]] }
  0x46   :  { %1285 = vmatprep.subr.bf16.mxu0 %v1508_v3  ;;  %1291 = vmatprep.subr.bf16.mxu1 %v1508_v3  ;;  %vm75_vm2 = vcmp.ge.s32.totalorder %v74_v19, 64  ;;  %vm76_vm3 = vcmp.lt.s32.totalorder %v74_v19, 96  ;;  %s1101_s2 = sld [smem:[#allocation2 + $0x1]]  ;;  %s1106_s23 = sld [smem:[#allocation2 + $0x2]] }
  0x47   :  { %vm1627_vm4 = vmand %vm75_vm2, %vm76_vm3  ;;  %s1112_s26 = sld [smem:[#allocation2 + $0x83]]  ;;  %s1117_s29 = sld [smem:[#allocation2 + $0x84]] }
  0x48   :  { %s1111_s0 = sld [smem:[#allocation2 + $0x3]]  ;;  %s1116_s7 = sld [smem:[#allocation2 + $0x4]] }
  0x49   :  { %1287 = vmatpush3.bf16.msra.mxu0 %v1610_v7  ;;  %1293 = vmatpush3.bf16.msra.mxu1 %v1610_v7  ;;  %s82_s6 = scalar_lea.vmem [#allocation6], %s1098_s3  ;;  %s1122_s10 = sld [smem:[#allocation2 + $0x85]] }
  0x4a   :  { %1294 = vmatprep.subr.bf16.mxu0 %v1508_v3  ;;  %1300 = vmatprep.subr.bf16.mxu1 %v1508_v3  ;;  %v83_v8 = vld [vmem:[%s82_s6] sm:$0x1]  ;;  %s79_s15 = scalar_lea.vmem [#allocation6], %s78_s30  ;;  %s1121_s11 = sld [smem:[#allocation2 + $0x5]] }
  0x4b   :  { %v85_v9 = vrot.slane %v83_v8, 7  ;;  %v80_v10 = vld [vmem:[%s79_s15] sm:$0x1]  ;;  %s198_s19 = scalar_lea.vmem [#allocation6], %s1102_s18  ;;  %s310_s24 = scalar_lea.vmem [#allocation6], %s1107_s22 }
  0x4c   :  { %1192 = vmatmul.mubr.f32.vlgmr.msra.gmra.mrb[0].mxu0 %v1510_v6  ;;  %v199_v34 = vld [vmem:[%s198_s19] sm:$0x1]  ;;  %s195_s20 = scalar_lea.vmem [#allocation6], %s1101_s2  ;;  %s307_s25 = scalar_lea.vmem [#allocation6], %s1106_s23 }
  0x4d   :  { %1296 = vmatpush3.bf16.msra.mxu0 %v1602_v4  ;;  %1213 = vmatprep.mubr.msk.f32.mxu0 %vm1509_vm0, %v1510_v6  ;;  %v88_v11 = vsel %vm87_vm1, %v80_v10, %v85_v9  ;;  %v201_v35 = vrot.slane %v199_v34, 7  ;;  %v196_v36 = vld [vmem:[%s195_s20] sm:$0x1]  ;;  %s422_s27 = scalar_lea.vmem [#allocation6], %s1112_s26  ;;  %s534_s8 = scalar_lea.vmem [#allocation6], %s1117_s29 }
  0x4e   :  { %1297 = vmatprep.subr.bf16.mxu0 %v1508_v3  ;;  %v311_v57 = vld [vmem:[%s310_s24] sm:$0x1]  ;;  %s419_s28 = scalar_lea.vmem [#allocation6], %s1111_s0  ;;  %s531_s9 = scalar_lea.vmem [#allocation6], %s1116_s7 }
  0x4f   :  { %v203_v37 = vsel %vm87_vm1, %v196_v36, %v201_v35  ;;  %v313_v58 = vrot.slane %v311_v57, 7  ;;  %v308_v59 = vld [vmem:[%s307_s25] sm:$0x1]  ;;  %s646_s12 = scalar_lea.vmem [#allocation6], %s1122_s10  ;;  %s1127_s14 = sld [smem:[#allocation2 + $0x86]] }
  0x50   :  { %s643_s13 = scalar_lea.vmem [#allocation6], %s1121_s11  ;;  %s1126_s1 = sld [smem:[#allocation2 + $0x6]] }
  0x51   :  { %1299 = vmatpush3.bf16.msra.mxu0 %v1610_v7  ;;  %v315_v60 = vsel %vm87_vm1, %v308_v59, %v313_v58  ;;  %s1132_s30 = sld [smem:[#allocation2 + $0x87]]  ;;  %s1513_s20 = smov [#allocation10]  }
  0x52   :  { %1306 = vmatprep.subr.bf16.mxu0 %v1508_v3  ;;  %s1131_s6 = sld [smem:[#allocation2 + $0x7]]  ;;  %s1071_s22 = sshll.u32 %s1513_s20, 4  ;;  %s1072_s22 = int_to_ptr.vmem [resolvable:$true] %s1071_s22 }
  0x53   :  { %s1472_s23 = scalar_lea.vmem %s1072_s22, 32  ;;  %p1477_p0 = scmp.lt.s32.totalorder %s1072_s22, %s1072_s22 }
  0x54   :  { %p1473_p13 = scmp.ne.s32.totalorder %s1072_s22, %s1472_s23  ;;  %p1478_p1 = scmp.lt.s32.totalorder %s1472_s23, %s1472_s23 }
  0x55   :  { %s758_s21 = scalar_lea.vmem [#allocation6], %s1127_s14 }
  0x56   :  { %s755_s3 = scalar_lea.vmem [#allocation6], %s1126_s1  ;;  %p1479_p2 = por %p1478_p1, %p1477_p0 }
  0x57   :  { %s870_s15 = scalar_lea.vmem [#allocation6], %s1132_s30 }
  0x58   :  { %s867_s18 = scalar_lea.vmem [#allocation6], %s1131_s6  ;;  %p1480_p3 = pnand %p1479_p2, %p1473_p13 }
 0x11f   :  { %v163_v12 = vpop.f32.mrb[0].mxu0 }
 0x120   :  { %v167_v13 = vadd.f32 %v163_v12, %v88_v11  ;;  %v1193_v14 = vpop.f32.mrb[1].mxu0 }
 0x122   :  { %v1099_v15 = vmul.f32 -1.442695, %v167_v13 }
 0x124   :  { %1348 = vpow2.f32 %v1099_v15 }
 0x12e   :  { %v1349_v16 = vpop.eup %1348 }
 0x12f   :  { %v171_v17 = vadd.f32 1.0, %v1349_v16 }
 0x131   :  { %1350 = vrcp.f32 %v171_v17 }
 0x13b   :  { %v1351_v20 = vpop.eup %1350 }
 0x13c   :  { %v174_v21 = vadd.f32 %v1351_v20, %v1351_v20 }
 0x13e   :  { %v1100_v23 = vadd.f32 -1.0, %v174_v21 }
 0x140   :  { %v176_v24 = vsel %vm1627_vm4, %v1100_v23, %v1351_v20  ;;  %v423_v20 = vld [vmem:[%s422_s27] sm:$0x1] }
 0x141   :  { %179 = vrot.lane.b32.xlu0 %v176_v24, %s1511_s16  ;;  %v177_v27 = vmul.f32 0.0, %v176_v24  ;;  %v425_v21 = vrot.slane %v423_v20, 7  ;;  %v420_v23 = vld [vmem:[%s419_s28] sm:$0x1] }
 0x1b3   :  { %v180_v25 = vpop.permute.xlu0 %179 }
 0x1b4   :  { %v182_v26 = vmul.f32 %v180_v25, %v176_v24 }
 0x1b6   :  { %184 = vrot.lane.b32.xlu0 %v182_v26, %s1512_s17 }
 0x228   :  { %v185_v28 = vpop.permute.xlu0 %184 }
 0x229   :  { %v187_v29 = vadd.f32 %v185_v28, %v177_v27 }
 0x22b   :  { %1352 = vtanh.f32 %v187_v29 }
 0x235   :  { %v1353_v30 = vpop.eup %1352 }
 0x236   :  { %190 = vrot.lane.b32.xlu1 %v1353_v30, %s1511_s16 }
 0x2a8   :  { %v191_v31 = vpop.permute.xlu1 %190 }
 0x2a9   :  { %v193_v32 = vmul.f32 %v191_v31, %v176_v24  ;;  %v427_v24 = vsel %vm87_vm1, %v420_v23, %v425_v21 }
 0x2ab   :  { %205 = vrot.lane.b32.xlu1 %v193_v32, %s1512_s17 }
 0x31d   :  { %v206_v33 = vpop.permute.xlu1 %205 }
 0x31e   :  { %1203 = vmatmul.mubr.msk.f32.vlgmr.msra.gmra.mrb[0].mxu1 %vm93_vm5, %v206_v33 }
 0x31f   :  { %1302 = vmatpush3.bf16.msra.mxu1 %v1602_v4  ;;  %1224 = vmatprep.mubr.msk.f32.mxu1 %vm1509_vm0, %v1510_v6 }
 0x320   :  { %1303 = vmatprep.subr.bf16.mxu1 %v1508_v3 }
 0x323   :  { %1305 = vmatpush3.bf16.msra.mxu1 %v1610_v7 }
 0x324   :  { %1312 = vmatprep.subr.bf16.mxu1 %v1508_v3 }
 0x3f1   :  { %v275_v38 = vpop.f32.mrb[0].mxu1 }
 0x3f2   :  { %v279_v39 = vadd.f32 %v275_v38, %v203_v37  ;;  %v1204_v40 = vpop.f32.mrb[1].mxu1 }
 0x3f4   :  { %v1104_v41 = vmul.f32 -1.442695, %v279_v39 }
 0x3f6   :  { %1354 = vpow2.f32 %v1104_v41 }
 0x400   :  { %v1355_v42 = vpop.eup %1354 }
 0x401   :  { %v283_v43 = vadd.f32 1.0, %v1355_v42 }
 0x403   :  { %1356 = vrcp.f32 %v283_v43 }
 0x40d   :  { %v1357_v44 = vpop.eup %1356 }
 0x40e   :  { %v286_v45 = vadd.f32 %v1357_v44, %v1357_v44 }
 0x410   :  { %v1105_v46 = vadd.f32 -1.0, %v286_v45 }
 0x412   :  { %v288_v47 = vsel %vm1627_vm4, %v1105_v46, %v1357_v44  ;;  %v535_v44 = vld [vmem:[%s534_s8] sm:$0x1] }
 0x413   :  { %291 = vrot.lane.b32.xlu0 %v288_v47, %s1511_s16  ;;  %v289_v50 = vmul.f32 %v288_v47, %v187_v29  ;;  %v537_v45 = vrot.slane %v535_v44, 7  ;;  %v532_v46 = vld [vmem:[%s531_s9] sm:$0x1] }
 0x485   :  { %v292_v48 = vpop.permute.xlu0 %291 }
 0x486   :  { %v294_v49 = vmul.f32 %v292_v48, %v288_v47 }
 0x488   :  { %296 = vrot.lane.b32.xlu1 %v294_v49, %s1512_s17 }
 0x4fa   :  { %v297_v51 = vpop.permute.xlu1 %296 }
 0x4fb   :  { %v299_v52 = vadd.f32 %v297_v51, %v289_v50 }
 0x4fd   :  { %1358 = vtanh.f32 %v299_v52 }
 0x507   :  { %v1359_v53 = vpop.eup %1358 }
 0x508   :  { %302 = vrot.lane.b32.xlu0 %v1359_v53, %s1511_s16 }
 0x57a   :  { %v303_v54 = vpop.permute.xlu0 %302 }
 0x57b   :  { %v305_v55 = vmul.f32 %v303_v54, %v288_v47  ;;  %v539_v47 = vsel %vm87_vm1, %v532_v46, %v537_v45 }
 0x57d   :  { %317 = vrot.lane.b32.xlu1 %v305_v55, %s1512_s17 }
 0x5ef   :  { %v318_v56 = vpop.permute.xlu1 %317 }
 0x5f0   :  { %1214 = vmatmul.mubr.msk.f32.vlgmr.msra.gmra.mrb[2].mxu0 %vm93_vm5, %v318_v56 }
 0x5f1   :  { %1308 = vmatpush3.bf16.msra.mxu0 %v1602_v4  ;;  %1235 = vmatprep.mubr.msk.f32.mxu0 %vm1509_vm0, %v1510_v6 }
 0x5f2   :  { %1309 = vmatprep.subr.bf16.mxu0 %v1508_v3 }
 0x5f5   :  { %1311 = vmatpush3.bf16.msra.mxu0 %v1610_v7 }
 0x5f6   :  { %1318 = vmatprep.subr.bf16.mxu0 %v1508_v3 }
 0x6c3   :  { %v387_v61 = vpop.f32.mrb[2].mxu0 }
 0x6c4   :  { %v391_v62 = vadd.f32 %v387_v61, %v315_v60  ;;  %v1215_v63 = vpop.f32.mrb[3].mxu0 }
 0x6c6   :  { %v1109_v0 = vmul.f32 -1.442695, %v391_v62 }
 0x6c8   :  { %1360 = vpow2.f32 %v1109_v0 }
 0x6d2   :  { %v1361_v1 = vpop.eup %1360 }
 0x6d3   :  { %v395_v2 = vadd.f32 1.0, %v1361_v1 }
 0x6d5   :  { %1362 = vrcp.f32 %v395_v2 }
 0x6df   :  { %v1363_v5 = vpop.eup %1362 }
 0x6e0   :  { %v398_v8 = vadd.f32 %v1363_v5, %v1363_v5 }
 0x6e2   :  { %v1110_v9 = vadd.f32 -1.0, %v398_v8 }
 0x6e4   :  { %v400_v10 = vsel %vm1627_vm4, %v1110_v9, %v1363_v5  ;;  %v647_v5 = vld [vmem:[%s646_s12] sm:$0x1] }
 0x6e5   :  { %403 = vrot.lane.b32.xlu0 %v400_v10, %s1511_s16  ;;  %v401_v13 = vmul.f32 %v400_v10, %v299_v52  ;;  %v649_v8 = vrot.slane %v647_v5, 7  ;;  %v644_v9 = vld [vmem:[%s643_s13] sm:$0x1] }
 0x757   :  { %v404_v11 = vpop.permute.xlu0 %403 }
 0x758   :  { %v406_v12 = vmul.f32 %v404_v11, %v400_v10 }
 0x75a   :  { %408 = vrot.lane.b32.xlu1 %v406_v12, %s1512_s17 }
 0x7cc   :  { %v409_v14 = vpop.permute.xlu1 %408 }
 0x7cd   :  { %v411_v15 = vadd.f32 %v409_v14, %v401_v13 }
 0x7cf   :  { %1364 = vtanh.f32 %v411_v15 }
 0x7d9   :  { %v1365_v16 = vpop.eup %1364 }
 0x7da   :  { %414 = vrot.lane.b32.xlu0 %v1365_v16, %s1511_s16 }
 0x84c   :  { %v415_v17 = vpop.permute.xlu0 %414 }
 0x84d   :  { %v417_v18 = vmul.f32 %v415_v17, %v400_v10  ;;  %v651_v10 = vsel %vm87_vm1, %v644_v9, %v649_v8 }
 0x84f   :  { %429 = vrot.lane.b32.xlu1 %v417_v18, %s1512_s17 }
 0x8c1   :  { %v430_v19 = vpop.permute.xlu1 %429 }
 0x8c2   :  { %1225 = vmatmul.mubr.msk.f32.vlgmr.msra.gmra.mrb[2].mxu1 %vm93_vm5, %v430_v19 }
 0x8c3   :  { %1314 = vmatpush3.bf16.msra.mxu1 %v1602_v4  ;;  %1246 = vmatprep.mubr.msk.f32.mxu1 %vm1509_vm0, %v1510_v6 }
 0x8c4   :  { %1315 = vmatprep.subr.bf16.mxu1 %v1508_v3 }
 0x8c7   :  { %1317 = vmatpush3.bf16.msra.mxu1 %v1610_v7 }
 0x8c8   :  { %1324 = vmatprep.subr.bf16.mxu1 %v1508_v3 }
 0x995   :  { %v499_v25 = vpop.f32.mrb[2].mxu1 }
 0x996   :  { %v503_v26 = vadd.f32 %v499_v25, %v427_v24  ;;  %v1226_v27 = vpop.f32.mrb[3].mxu1 }
 0x998   :  { %v1114_v28 = vmul.f32 -1.442695, %v503_v26 }
 0x99a   :  { %1366 = vpow2.f32 %v1114_v28 }
 0x9a4   :  { %v1367_v29 = vpop.eup %1366 }
 0x9a5   :  { %v507_v30 = vadd.f32 1.0, %v1367_v29  ;;  %v759_v29 = vld [vmem:[%s758_s21] sm:$0x1] }
 0x9a7   :  { %1368 = vrcp.f32 %v507_v30  ;;  %v761_v30 = vrot.slane %v759_v29, 7 }
 0x9b1   :  { %v1369_v31 = vpop.eup %1368 }
 0x9b2   :  { %v510_v32 = vadd.f32 %v1369_v31, %v1369_v31 }
 0x9b4   :  { %v1115_v33 = vadd.f32 -1.0, %v510_v32 }
 0x9b6   :  { %v512_v34 = vsel %vm1627_vm4, %v1115_v33, %v1369_v31  ;;  %v756_v31 = vld [vmem:[%s755_s3] sm:$0x1] }
 0x9b7   :  { %515 = vrot.lane.b32.xlu0 %v512_v34, %s1511_s16  ;;  %v513_v37 = vmul.f32 %v512_v34, %v411_v15  ;;  %v763_v32 = vsel %vm87_vm1, %v756_v31, %v761_v30 }
 0xa29   :  { %v516_v35 = vpop.permute.xlu0 %515 }
 0xa2a   :  { %v518_v36 = vmul.f32 %v516_v35, %v512_v34 }
 0xa2c   :  { %520 = vrot.lane.b32.xlu1 %v518_v36, %s1512_s17 }
 0xa9e   :  { %v521_v38 = vpop.permute.xlu1 %520 }
 0xa9f   :  { %v523_v39 = vadd.f32 %v521_v38, %v513_v37 }
 0xaa1   :  { %1370 = vtanh.f32 %v523_v39 }
 0xaab   :  { %v1371_v40 = vpop.eup %1370 }
 0xaac   :  { %526 = vrot.lane.b32.xlu0 %v1371_v40, %s1511_s16 }
 0xb1e   :  { %v527_v41 = vpop.permute.xlu0 %526 }
 0xb1f   :  { %v529_v42 = vmul.f32 %v527_v41, %v512_v34 }
 0xb21   :  { %541 = vrot.lane.b32.xlu1 %v529_v42, %s1512_s17 }
 0xb93   :  { %v542_v43 = vpop.permute.xlu1 %541 }
 0xb94   :  { %1236 = vmatmul.mubr.msk.f32.vlgmr.msra.gmra.mrb[4].mxu0 %vm93_vm5, %v542_v43 }
 0xb95   :  { %1320 = vmatpush3.bf16.msra.mxu0 %v1602_v4  ;;  %1257 = vmatprep.mubr.msk.f32.mxu0 %vm1509_vm0, %v1510_v6 }
 0xb96   :  { %1321 = vmatprep.subr.bf16.mxu0 %v1508_v3 }
 0xb99   :  { %1323 = vmatpush3.bf16.msra.mxu0 %v1610_v7 }
 0xb9a   :  { %1330 = vmatprep.subr.bf16.mxu0 %v1508_v3 }
 0xc67   :  { %v611_v48 = vpop.f32.mrb[4].mxu0 }
 0xc68   :  { %v615_v49 = vadd.f32 %v611_v48, %v539_v47  ;;  %v1237_v50 = vpop.f32.mrb[5].mxu0 }
 0xc6a   :  { %v1119_v51 = vmul.f32 -1.442695, %v615_v49 }
 0xc6c   :  { %1372 = vpow2.f32 %v1119_v51  ;;  %v871_v51 = vld [vmem:[%s870_s15] sm:$0x1] }
 0xc76   :  { %v1373_v52 = vpop.eup %1372 }
 0xc77   :  { %v619_v53 = vadd.f32 1.0, %v1373_v52  ;;  %v873_v52 = vrot.slane %v871_v51, 7 }
 0xc79   :  { %1374 = vrcp.f32 %v619_v53  ;;  %v868_v53 = vld [vmem:[%s867_s18] sm:$0x1] }
 0xc83   :  { %v1375_v54 = vpop.eup %1374 }
 0xc84   :  { %v622_v55 = vadd.f32 %v1375_v54, %v1375_v54 }
 0xc86   :  { %v1120_v56 = vadd.f32 -1.0, %v622_v55 }
 0xc88   :  { %v624_v57 = vsel %vm1627_vm4, %v1120_v56, %v1375_v54  ;;  %v875_v54 = vsel %vm87_vm1, %v868_v53, %v873_v52 }
 0xc89   :  { %627 = vrot.lane.b32.xlu0 %v624_v57, %s1511_s16  ;;  %v625_v60 = vmul.f32 %v624_v57, %v523_v39 }
 0xcfb   :  { %v628_v58 = vpop.permute.xlu0 %627 }
 0xcfc   :  { %v630_v59 = vmul.f32 %v628_v58, %v624_v57 }
 0xcfe   :  { %632 = vrot.lane.b32.xlu1 %v630_v59, %s1512_s17 }
 0xd70   :  { %v633_v61 = vpop.permute.xlu1 %632 }
 0xd71   :  { %v635_v62 = vadd.f32 %v633_v61, %v625_v60 }
 0xd73   :  { %1376 = vtanh.f32 %v635_v62 }
 0xd7d   :  { %v1377_v63 = vpop.eup %1376 }
 0xd7e   :  { %638 = vrot.lane.b32.xlu0 %v1377_v63, %s1511_s16 }
 0xdf0   :  { %v639_v0 = vpop.permute.xlu0 %638 }
 0xdf1   :  { %v641_v1 = vmul.f32 %v639_v0, %v624_v57 }
 0xdf3   :  { %653 = vrot.lane.b32.xlu1 %v641_v1, %s1512_s17 }
 0xe65   :  { %v654_v2 = vpop.permute.xlu1 %653 }
 0xe66   :  { %1247 = vmatmul.mubr.msk.f32.vlgmr.msra.gmra.mrb[4].mxu1 %vm93_vm5, %v654_v2 }
 0xe67   :  { %1326 = vmatpush3.bf16.msra.mxu1 %v1602_v4  ;;  %1268 = vmatprep.mubr.msk.f32.mxu1 %vm1509_vm0, %v1510_v6 }
 0xe68   :  { %1327 = vmatprep.subr.bf16.mxu1 %v1508_v3 }
 0xe6b   :  { %1329 = vmatpush3.bf16.msra.mxu1 %v1610_v7 }
 0xf39   :  { %v723_v11 = vpop.f32.mrb[4].mxu1 }
 0xf3a   :  { %v727_v12 = vadd.f32 %v723_v11, %v651_v10  ;;  %v1248_v13 = vpop.f32.mrb[5].mxu1  ;;  %v978_v10 = vld [vmem:[#allocation9] sm:$0xff]  ;;  %v979_v11 = vld [vmem:[#allocation9 + $0x8] sm:$0xff] }
 0xf3b   :  { %v1331_v13 = vpack.c.bf16 %v979_v11, %v978_v10 }
 0xf3c   :  { %v1124_v4 = vmul.f32 -1.442695, %v727_v12  ;;  %v980_v12 = vld [vmem:[#allocation9 + $0x10] sm:$0xff] }
 0xf3e   :  { %1378 = vpow2.f32 %v1124_v4  ;;  %v981_v4 = vld [vmem:[#allocation9 + $0x18] sm:$0xff] }
 0xf48   :  { %v1379_v14 = vpop.eup %1378 }
 0xf49   :  { %v731_v15 = vadd.f32 1.0, %v1379_v14  ;;  %v1334_v14 = vpack.c.bf16 %v981_v4, %v980_v12 }
 0xf4b   :  { %1380 = vrcp.f32 %v731_v15 }
 0xf55   :  { %v1381_v16 = vpop.eup %1380 }
 0xf56   :  { %v734_v17 = vadd.f32 %v1381_v16, %v1381_v16 }
 0xf58   :  { %v1125_v7 = vadd.f32 -1.0, %v734_v17 }
 0xf5a   :  { %v736_v18 = vsel %vm1627_vm4, %v1125_v7, %v1381_v16  ;;  %v1136_v7 = vld [vmem:[%s1745_s4] ss:$0 sm:$0xff] }
 0xf5b   :  { %739 = vrot.lane.b32.xlu0 %v736_v18, %s1511_s16  ;;  %v737_v21 = vmul.f32 %v736_v18, %v635_v62 }
 0xfcd   :  { %v740_v19 = vpop.permute.xlu0 %739 }
 0xfce   :  { %v742_v20 = vmul.f32 %v740_v19, %v736_v18 }
 0xfd0   :  { %744 = vrot.lane.b32.xlu1 %v742_v20, %s1512_s17 }
0x1042   :  { %v745_v23 = vpop.permute.xlu1 %744 }
0x1043   :  { %v747_v24 = vadd.f32 %v745_v23, %v737_v21 }
0x1045   :  { %1382 = vtanh.f32 %v747_v24 }
0x104f   :  { %v1383_v25 = vpop.eup %1382 }
0x1050   :  { %750 = vrot.lane.b32.xlu0 %v1383_v25, %s1511_s16 }
0x10c2   :  { %v751_v26 = vpop.permute.xlu0 %750 }
0x10c3   :  { %v753_v27 = vmul.f32 %v751_v26, %v736_v18 }
0x10c5   :  { %765 = vrot.lane.b32.xlu1 %v753_v27, %s1512_s17 }
0x1137   :  { %v766_v28 = vpop.permute.xlu1 %765 }
0x1138   :  { %1258 = vmatmul.mubr.msk.f32.vlgmr.msra.gmra.mrb[6].mxu0 %vm93_vm5, %v766_v28 }
0x1139   :  { %1279 = vmatprep.mubr.msk.f32.mxu0 %vm1509_vm0, %v1510_v6  ;;  %1332 = vmatpush3.bf16.msra.mxu0 %v1331_v13 }
0x113a   :  { %1333 = vmatprep.subr.bf16.mxu0 %v1508_v3 }
0x113d   :  { %1335 = vmatpush3.bf16.msra.mxu0 %v1334_v14 }
0x120b   :  { %v835_v33 = vpop.f32.mrb[6].mxu0 }
0x120c   :  { %v839_v34 = vadd.f32 %v835_v33, %v763_v32  ;;  %v1259_v35 = vpop.f32.mrb[7].mxu0 }
0x120e   :  { %v1129_v36 = vmul.f32 -1.442695, %v839_v34 }
0x1210   :  { %1384 = vpow2.f32 %v1129_v36 }
0x121a   :  { %v1385_v37 = vpop.eup %1384 }
0x121b   :  { %v843_v38 = vadd.f32 1.0, %v1385_v37 }
0x121d   :  { %1386 = vrcp.f32 %v843_v38 }
0x1227   :  { %v1387_v39 = vpop.eup %1386 }
0x1228   :  { %v846_v40 = vadd.f32 %v1387_v39, %v1387_v39 }
0x122a   :  { %v1130_v6 = vadd.f32 -1.0, %v846_v40 }
0x122c   :  { %v848_v41 = vsel %vm1627_vm4, %v1130_v6, %v1387_v39 }
0x122d   :  { %851 = vrot.lane.b32.xlu0 %v848_v41, %s1511_s16  ;;  %v849_v44 = vmul.f32 %v848_v41, %v747_v24 }
0x129f   :  { %v852_v42 = vpop.permute.xlu0 %851 }
0x12a0   :  { %v854_v43 = vmul.f32 %v852_v42, %v848_v41 }
0x12a2   :  { %856 = vrot.lane.b32.xlu1 %v854_v43, %s1512_s17 }
0x1314   :  { %v857_v45 = vpop.permute.xlu1 %856 }
0x1315   :  { %v859_v46 = vadd.f32 %v857_v45, %v849_v44 }
0x1317   :  { %1388 = vtanh.f32 %v859_v46 }
0x1321   :  { %v1389_v47 = vpop.eup %1388 }
0x1322   :  { %862 = vrot.lane.b32.xlu0 %v1389_v47, %s1511_s16 }
0x1394   :  { %v863_v48 = vpop.permute.xlu0 %862 }
0x1395   :  { %v865_v49 = vmul.f32 %v863_v48, %v848_v41 }
0x1397   :  { %877 = vrot.lane.b32.xlu1 %v865_v49, %s1512_s17 }
0x1409   :  { %v878_v50 = vpop.permute.xlu1 %877 }
0x140a   :  { %1269 = vmatmul.mubr.msk.f32.vlgmr.msra.gmra.mrb[6].mxu1 %vm93_vm5, %v878_v50 }
0x14dd   :  { %v947_v55 = vpop.f32.mrb[6].mxu1 }
0x14de   :  { %v951_v56 = vadd.f32 %v947_v55, %v875_v54  ;;  %v1270_v57 = vpop.f32.mrb[7].mxu1 }
0x14e0   :  { %v1134_v58 = vmul.f32 -1.442695, %v951_v56 }
0x14e2   :  { %1390 = vpow2.f32 %v1134_v58 }
0x14ec   :  { %v1391_v59 = vpop.eup %1390 }
0x14ed   :  { %v955_v60 = vadd.f32 1.0, %v1391_v59 }
0x14ef   :  { %1392 = vrcp.f32 %v955_v60 }
0x14f9   :  { %v1393_v61 = vpop.eup %1392 }
0x14fa   :  { %v958_v62 = vadd.f32 %v1393_v61, %v1393_v61 }
0x14fc   :  { %v1135_v63 = vadd.f32 -1.0, %v958_v62 }
0x14fe   :  { %v960_v0 = vsel %vm1627_vm4, %v1135_v63, %v1393_v61 }
0x14ff   :  { %963 = vrot.lane.b32.xlu0 %v960_v0, %s1511_s16  ;;  %v961_v5 = vmul.f32 %v960_v0, %v859_v46 }
0x1571   :  { %v964_v1 = vpop.permute.xlu0 %963 }
0x1572   :  { %v966_v2 = vmul.f32 %v964_v1, %v960_v0 }
0x1574   :  { %968 = vrot.lane.b32.xlu1 %v966_v2, %s1512_s17 }
0x15e6   :  { %v969_v8 = vpop.permute.xlu1 %968 }
0x15e7   :  { %v971_v9 = vadd.f32 %v969_v8, %v961_v5 }
0x15e9   :  { %1394 = vtanh.f32 %v971_v9 }
0x15f3   :  { %v1395_v22 = vpop.eup %1394 }
0x15f4   :  { %974 = vrot.lane.b32.xlu0 %v1395_v22, %s1511_s16 }
0x1666   :  { %v975_v15 = vpop.permute.xlu0 %974 }
0x1667   :  { %v977_v16 = vmul.f32 %v975_v15, %v960_v0 }
0x1669   :  { %990 = vrot.lane.b32.xlu1 %v977_v16, %s1512_s17 }
0x16db   :  { %v991_v17 = vpop.permute.xlu1 %990 }
0x16dc   :  { %1280 = vmatmul.mubr.msk.f32.vlgmr.msra.gmra.mrb[8].mxu0 %vm93_vm5, %v991_v17 }
0x17af   :  { %v1060_v18 = vpop.f32.mrb[8].mxu0 }
0x17b0   :  { %v1061_v19 = vadd.f32 %v1136_v7, %v1060_v18  ;;  %v1281_v3 = vpop.f32.mrb[9].mxu0 }
0x17b2   :  { %1064 = vst [vmem:[#allocation10] sm:$0x3] %v1061_v19 }
0x17b3   :  { %1483 = shalt.err (!%p1480_p3)
}
0x17b4   :  { %s1484_s24 = scalar_lea.hbm %s1746_s5, 32 }
0x17b5   :  { %p1485_p4 = scmp.ne.s32.totalorder %s1746_s5, %s1484_s24  ;;  %p1488_p5 = scmp.lt.u32.totalorder %s1484_s24, %s1746_s5 }
0x17b7   :  { %p1490_p6 = pnand %p1488_p5, %p1485_p4 }
0x17b9   :  { %1493 = shalt.err (!%p1490_p6)
}
0x17ba   :  { %1074 = dma.vmem_to_hbm [thread:$0]  %s1072_s22, 32, %s1746_s5, [#allocation4]  }
0x17bb   :  { %1500 = dma.done.wait [#allocation4], 32  }
0x17bc   :  { %1501 = vsyncadd [#allocation4], 4294967264 }
0x17bd   :  { %1078 = vsyncpa [#allocation3], 1 }
0x17be   :  { %1079 = vsyncpa [#allocation8], 1 }
0x17bf   :  { %1080 = vsyncpa [#allocation4], 1 }
0x17c0   :  { %1081 = vsyncpa [#allocation5], 1 }

</bundles_post_ra>
